<compile_context>
chip_gen: v6e
topology: v6e:2x2x1
jax: 0.10.0
libtpu: 0.0.40
codegen_flags: <defaults>
</compile_context>

<pallas_src>
import functools

import jax
import jax.numpy as jnp
from jax.experimental import pallas as pl
from jax.experimental.pallas import tpu as pltpu

# ---- module / example shapes -------------------------------------------------
BATCH = 2          # A
SEQ_LEN = 8        # T
EMBED_DIM = 32     # C == k_dims of the LayerNorm
EPS = 1e-5

LANES = 128        # TPU vreg lane width
MAX_ROW_TILE = 1024  # packed rows per grid step (1024*128*4B = 512 KiB / block)


def layer_norm_kernel(x_ref, w_ref, b_ref, seg_ref, o_ref, *, c, eps):
    """LayerNorm over `c`-wide segments of lane-packed rows.

    x_ref:   (TR, 128)  lane-packed rows (128/c logical rows per vector row)
    w_ref:   (1, 128)   scale, tiled per segment
    b_ref:   (1, 128)   shift, tiled per segment
    seg_ref: (128, 128) block-diagonal ones (c x c blocks) for segmented sums
    o_ref:   (TR, 128)
    """
    x = x_ref[...].astype(jnp.float32)        # f32 accumulation regardless of I/O dtype
    seg = seg_ref[...]                        # (128, 128) f32

    inv_c = 1.0 / c
    # Segmented sum + per-segment broadcast in one MXU op each; s1/s2 are
    # independent so both reductions overlap.
    s1 = jnp.dot(x, seg, preferred_element_type=jnp.float32)        # sum(x)   per segment
    s2 = jnp.dot(x * x, seg, preferred_element_type=jnp.float32)    # sum(x^2) per segment

    mu = s1 * inv_c
    var = s2 * inv_c - mu * mu                # one-pass (biased) variance
    rstd = jax.lax.rsqrt(var + eps)           # EUP rsqrt, no divide

    o_ref[...] = ((x - mu) * rstd * w_ref[0] + b_ref[0]).astype(o_ref.dtype)


@jax.jit
def layer_norm(x, weight, bias=None):
    """LayerNorm over the last dim of x (any leading dims), eps=1e-5."""
    orig_shape = x.shape
    c = orig_shape[-1]
    assert LANES % c == 0, "lane-packing path requires C to divide 128"
    pack = LANES // c                              # logical rows per vector row

    x2d = x.reshape(-1, c)                         # (N, C)
    n = x2d.shape[0]

    if bias is None:                               # bias=False module config
        bias = jnp.zeros((c,), x.dtype)

    # --- lane packing + row tiling (all static shape math) -------------------
    n_packed = pl.cdiv(n, pack)                    # packed (128-lane) rows
    tile = min(MAX_ROW_TILE, n_packed)             # packed rows per grid step
    n_tiles = pl.cdiv(n_packed, tile)
    n_padded = n_tiles * tile * pack               # logical rows after padding
    if n_padded != n:
        x2d = jnp.pad(x2d, ((0, n_padded - n), (0, 0)))
    xp = x2d.reshape(n_tiles * tile, LANES)        # (Np, 128) lane-dense

    wp = jnp.tile(weight.reshape(1, c).astype(jnp.float32), (1, pack))   # (1, 128)
    bp = jnp.tile(bias.reshape(1, c).astype(jnp.float32), (1, pack))     # (1, 128)

    # (128, 128) block-diagonal ones: sums each c-wide segment and broadcasts it.
    lane = jnp.arange(LANES)
    seg = (lane[:, None] // c == lane[None, :] // c).astype(jnp.float32)

    kernel = functools.partial(layer_norm_kernel, c=c, eps=EPS)

    out = pl.pallas_call(
        kernel,
        out_shape=jax.ShapeDtypeStruct((n_tiles * tile, LANES), x.dtype),
        grid=(n_tiles,),
        in_specs=[
            pl.BlockSpec((tile, LANES), lambda i: (i, 0)),   # x tile
            pl.BlockSpec((1, LANES), lambda i: (0, 0)),      # weight (resident)
            pl.BlockSpec((1, LANES), lambda i: (0, 0)),      # bias   (resident)
            pl.BlockSpec((LANES, LANES), lambda i: (0, 0)),  # segment matrix (resident)
        ],
        out_specs=pl.BlockSpec((tile, LANES), lambda i: (i, 0)),
        compiler_params=pltpu.CompilerParams(
            dimension_semantics=("parallel",)),
    )(xp, wp, bp, seg)

    out = out.reshape(-1, c)[:n]                   # drop padded rows, unpack lanes
    return out.reshape(orig_shape)


def ref_layer_norm(x, weight, bias, eps=EPS):
    """Pure-JAX reference matching torch.nn.functional.layer_norm."""
    mu = jnp.mean(x, axis=-1, keepdims=True)
    var = jnp.mean((x - mu) ** 2, axis=-1, keepdims=True)
    return (x - mu) / jnp.sqrt(var + eps) * weight + bias


if __name__ == "__main__":
    key = jax.random.PRNGKey(0)
    kx, kw, kb = jax.random.split(key, 3)

    x = jax.random.normal(kx, (BATCH, SEQ_LEN, EMBED_DIM), jnp.float32)

    # Module init is weight=ones, bias=zeros; perturb so the test is non-trivial.
    weight = jnp.ones((EMBED_DIM,), jnp.float32) + \
        0.1 * jax.random.normal(kw, (EMBED_DIM,), jnp.float32)
    bias = 0.1 * jax.random.normal(kb, (EMBED_DIM,), jnp.float32)

    # With bias (bias=True module config).
    out = jax.block_until_ready(layer_norm(x, weight, bias))
    ref = ref_layer_norm(x, weight, bias)
    assert out.shape == (BATCH, SEQ_LEN, EMBED_DIM)
    assert jnp.allclose(out, ref, atol=1e-4, rtol=1e-4), "mismatch vs JAX reference"

    # Without bias (bias=False module config -> bias is None).
    out_nb = jax.block_until_ready(layer_norm(x, weight, None))
    ref_nb = ref_layer_norm(x, weight, jnp.zeros_like(weight))
    assert jnp.allclose(out_nb, ref_nb, atol=1e-4, rtol=1e-4), "mismatch (no-bias path)"

    print("KERNEL_OK")
</pallas_src>

<mosaic_0001>
module attributes {stable_mosaic.version = 11 : i64} {
  func.func @layer_norm_kernel(%arg0: i32, %arg1: memref<4x128xf32, #tpu.memory_space<vmem>>, %arg2: memref<1x128xf32, #tpu.memory_space<vmem>>, %arg3: memref<1x128xf32, #tpu.memory_space<vmem>>, %arg4: memref<128x128xf32, #tpu.memory_space<vmem>>, %arg5: memref<4x128xf32, #tpu.memory_space<vmem>>) attributes {dimension_semantics = [#tpu.dimension_semantics<parallel>], iteration_bounds = array<i64: 1>, scalar_prefetch = 0 : i64, scratch_operands = 0 : i64, tpu.core_type = #tpu.core_type<tc>, window_params = [{transform_indices = @transform_0, window_bounds = array<i64: 4, 128>}, {pipeline_mode = #tpu.pipeline_mode<synchronous>, transform_indices = @transform_1, window_bounds = array<i64: 1, 128>}, {pipeline_mode = #tpu.pipeline_mode<synchronous>, transform_indices = @transform_2, window_bounds = array<i64: 1, 128>}, {pipeline_mode = #tpu.pipeline_mode<synchronous>, transform_indices = @transform_3, window_bounds = array<i64: 128, 128>}, {transform_indices = @transform_4, window_bounds = array<i64: 4, 128>}]} {
    %c0 = arith.constant 0 : index
    %c0_0 = arith.constant 0 : index
    %0 = vector.load %arg1[%c0, %c0_0] : memref<4x128xf32, #tpu.memory_space<vmem>>, vector<4x128xf32>
    %c0_1 = arith.constant 0 : index
    %c0_2 = arith.constant 0 : index
    %1 = vector.load %arg4[%c0_1, %c0_2] : memref<128x128xf32, #tpu.memory_space<vmem>>, vector<128x128xf32>
    %cst = arith.constant dense<0.000000e+00> : vector<4x128xf32>
    %2 = tpu.matmul %0, %1, %cst {dimension_numbers = #tpu.dot_dimension_numbers<[1], [0], [0], [1], [0, 0, 1, 1], [], []>} : vector<4x128xf32>, vector<128x128xf32>, vector<4x128xf32> -> vector<4x128xf32>
    %3 = arith.mulf %0, %0 : vector<4x128xf32>
    %cst_3 = arith.constant dense<0.000000e+00> : vector<4x128xf32>
    %4 = tpu.matmul %3, %1, %cst_3 {dimension_numbers = #tpu.dot_dimension_numbers<[1], [0], [0], [1], [0, 0, 1, 1], [], []>} : vector<4x128xf32>, vector<128x128xf32>, vector<4x128xf32> -> vector<4x128xf32>
    %cst_4 = arith.constant 3.125000e-02 : f32
    %5 = vector.broadcast %cst_4 : f32 to vector<4x128xf32>
    %6 = arith.mulf %2, %5 : vector<4x128xf32>
    %cst_5 = arith.constant 3.125000e-02 : f32
    %7 = vector.broadcast %cst_5 : f32 to vector<4x128xf32>
    %8 = arith.mulf %4, %7 : vector<4x128xf32>
    %9 = arith.mulf %6, %6 : vector<4x128xf32>
    %10 = arith.subf %8, %9 : vector<4x128xf32>
    %cst_6 = arith.constant 9.99999974E-6 : f32
    %11 = vector.broadcast %cst_6 : f32 to vector<4x128xf32>
    %12 = arith.addf %10, %11 : vector<4x128xf32>
    %13 = math.rsqrt %12 : vector<4x128xf32>
    %14 = arith.subf %0, %6 : vector<4x128xf32>
    %15 = arith.mulf %14, %13 : vector<4x128xf32>
    %c0_7 = arith.constant 0 : index
    %c0_8 = arith.constant 0 : index
    %16 = vector.load %arg2[%c0_7, %c0_8] : memref<1x128xf32, #tpu.memory_space<vmem>>, vector<1x128xf32>
    %17 = vector.shape_cast %16 : vector<1x128xf32> to vector<128xf32>
    %18 = vector.shape_cast %17 : vector<128xf32> to vector<1x128xf32>
    %19 = vector.broadcast %18 : vector<1x128xf32> to vector<4x128xf32>
    %20 = arith.mulf %15, %19 : vector<4x128xf32>
    %c0_9 = arith.constant 0 : index
    %c0_10 = arith.constant 0 : index
    %21 = vector.load %arg3[%c0_9, %c0_10] : memref<1x128xf32, #tpu.memory_space<vmem>>, vector<1x128xf32>
    %22 = vector.shape_cast %21 : vector<1x128xf32> to vector<128xf32>
    %23 = vector.shape_cast %22 : vector<128xf32> to vector<1x128xf32>
    %24 = vector.broadcast %23 : vector<1x128xf32> to vector<4x128xf32>
    %25 = arith.addf %20, %24 : vector<4x128xf32>
    %c0_11 = arith.constant 0 : index
    %c0_12 = arith.constant 0 : index
    %26 = vector.load %arg5[%c0_11, %c0_12] : memref<4x128xf32, #tpu.memory_space<vmem>>, vector<4x128xf32>
    tpu.vector_store %arg5[%c0_11, %c0_12], %25 {strides = array<i32>} : memref<4x128xf32, #tpu.memory_space<vmem>>, vector<4x128xf32>,
    return
  }
  func.func @transform_0(%arg0: i32) -> (i32, i32) {
    %c0_i32 = arith.constant 0 : i32
    %c0_i32_0 = arith.constant 0 : i32
    return %arg0, %c0_i32 : i32, i32
  }
  func.func @transform_1(%arg0: i32) -> (i32, i32) {
    %c0_i32 = arith.constant 0 : i32
    %c0_i32_0 = arith.constant 0 : i32
    %c0_i32_1 = arith.constant 0 : i32
    return %c0_i32, %c0_i32_0 : i32, i32
  }
  func.func @transform_2(%arg0: i32) -> (i32, i32) {
    %c0_i32 = arith.constant 0 : i32
    %c0_i32_0 = arith.constant 0 : i32
    %c0_i32_1 = arith.constant 0 : i32
    return %c0_i32, %c0_i32_0 : i32, i32
  }
  func.func @transform_3(%arg0: i32) -> (i32, i32) {
    %c0_i32 = arith.constant 0 : i32
    %c0_i32_0 = arith.constant 0 : i32
    %c0_i32_1 = arith.constant 0 : i32
    return %c0_i32, %c0_i32_0 : i32, i32
  }
  func.func @transform_4(%arg0: i32) -> (i32, i32) {
    %c0_i32 = arith.constant 0 : i32
    %c0_i32_0 = arith.constant 0 : i32
    return %arg0, %c0_i32 : i32, i32
  }
}

</mosaic_0001>

<bundles_post_ra>
// kernel: layer_norm.1
= control target key start
LH: loop header
LB: loop body
LE: loop exit
PB: predicated region body
PF: predicated region fallthrough
CT: control target
= control target key end

     0   :  { %v314_v0 = vmov 0.0   ;;  %vm315_vm0 = vmmov 0   ;;  %s435_s3 = inlined_call_operand.vmem [shape: f32[128,128], index: 3, kind: input, shape index: {}]   ;;  %s436_s0 = inlined_call_operand.vmem [shape: f32[4,128], index: 0, kind: input, shape index: {}]   ;;  %s437_s1 = inlined_call_operand.vmem [shape: f32[1,128], index: 1, kind: input, shape index: {}]   ;;  %s438_s2 = inlined_call_operand.vmem [shape: f32[1,128], index: 2, kind: input, shape index: {}]   ;;  %s439_s4 = inlined_call_operand.vmem [shape: f32[4,128], index: 4, kind: output, shape index: {}]  }
   0x1   :  { %240 = vmatprep.subr.mxu0 %v314_v0  ;;  %275 = vmatprep.subr.mxu1 %v314_v0  ;;  %v33_v1 = vld [vmem:[%s435_s3 + $0x78] sm:$0xff]  ;;  %v32_v2 = vld [vmem:[%s435_s3 + $0x70] sm:$0xff]  ;;  %v31_v3 = vld [vmem:[%s435_s3 + $0x68] sm:$0xff] }
   0x2   :  { %241 = vmatpush3.msra.mxu0 %v33_v1  ;;  %276 = vmatpush3.msra.mxu1 %v33_v1  ;;  %v30_v4 = vld [vmem:[%s435_s3 + $0x60] sm:$0xff]  ;;  %v29_v5 = vld [vmem:[%s435_s3 + $0x58] sm:$0xff]  ;;  %v28_v6 = vld [vmem:[%s435_s3 + $0x50] sm:$0xff] }
   0x3   :  { %242 = vmatprep.subr.mxu0 %v314_v0  ;;  %277 = vmatprep.subr.mxu1 %v314_v0  ;;  %v27_v7 = vld [vmem:[%s435_s3 + $0x48] sm:$0xff]  ;;  %v26_v8 = vld [vmem:[%s435_s3 + $0x40] sm:$0xff]  ;;  %v25_v9 = vld [vmem:[%s435_s3 + $0x38] sm:$0xff] }
   0x4   :  { %243 = vmatpush3.msra.mxu0 %v32_v2  ;;  %278 = vmatpush3.msra.mxu1 %v32_v2  ;;  %v24_v10 = vld [vmem:[%s435_s3 + $0x30] sm:$0xff]  ;;  %v23_v11 = vld [vmem:[%s435_s3 + $0x28] sm:$0xff]  ;;  %v22_v12 = vld [vmem:[%s435_s3 + $0x20] sm:$0xff] }
   0x5   :  { %244 = vmatprep.subr.mxu0 %v314_v0  ;;  %279 = vmatprep.subr.mxu1 %v314_v0  ;;  %v21_v13 = vld [vmem:[%s435_s3 + $0x18] sm:$0xff]  ;;  %v20_v14 = vld [vmem:[%s435_s3 + $0x10] sm:$0xff]  ;;  %v19_v15 = vld [vmem:[%s435_s3 + $0x8] sm:$0xff] }
   0x6   :  { %245 = vmatpush3.msra.mxu0 %v31_v3  ;;  %280 = vmatpush3.msra.mxu1 %v31_v3  ;;  %v17_v16 = vld [vmem:[%s436_s0] sm:$0xf] }
   0x7   :  { %246 = vmatprep.subr.mxu0 %v314_v0  ;;  %281 = vmatprep.subr.mxu1 %v314_v0  ;;  %v18_v17 = vld [vmem:[%s435_s3] sm:$0xff]  ;;  %v104_v18 = vmul.f32 %v17_v16, %v17_v16 }
   0x8   :  { %247 = vmatpush3.msra.mxu0 %v30_v4  ;;  %282 = vmatpush3.msra.mxu1 %v30_v4  ;;  %v204_v30 = vld [vmem:[%s437_s1] ss:$0 sm:$0xff] }
   0x9   :  { %248 = vmatprep.subr.mxu0 %v314_v0  ;;  %283 = vmatprep.subr.mxu1 %v314_v0  ;;  %v205_v32 = vld [vmem:[%s438_s2] ss:$0 sm:$0xff] }
   0xa   :  { %249 = vmatpush3.msra.mxu0 %v29_v5  ;;  %284 = vmatpush3.msra.mxu1 %v29_v5 }
   0xb   :  { %250 = vmatprep.subr.mxu0 %v314_v0  ;;  %285 = vmatprep.subr.mxu1 %v314_v0 }
   0xc   :  { %251 = vmatpush3.msra.mxu0 %v28_v6  ;;  %286 = vmatpush3.msra.mxu1 %v28_v6 }
   0xd   :  { %252 = vmatprep.subr.mxu0 %v314_v0  ;;  %287 = vmatprep.subr.mxu1 %v314_v0 }
   0xe   :  { %253 = vmatpush3.msra.mxu0 %v27_v7  ;;  %288 = vmatpush3.msra.mxu1 %v27_v7 }
   0xf   :  { %254 = vmatprep.subr.mxu0 %v314_v0  ;;  %289 = vmatprep.subr.mxu1 %v314_v0 }
  0x10   :  { %255 = vmatpush3.msra.mxu0 %v26_v8  ;;  %290 = vmatpush3.msra.mxu1 %v26_v8 }
  0x11   :  { %256 = vmatprep.subr.mxu0 %v314_v0  ;;  %291 = vmatprep.subr.mxu1 %v314_v0 }
  0x12   :  { %257 = vmatpush3.msra.mxu0 %v25_v9  ;;  %292 = vmatpush3.msra.mxu1 %v25_v9 }
  0x13   :  { %258 = vmatprep.subr.mxu0 %v314_v0  ;;  %293 = vmatprep.subr.mxu1 %v314_v0 }
  0x14   :  { %259 = vmatpush3.msra.mxu0 %v24_v10  ;;  %294 = vmatpush3.msra.mxu1 %v24_v10 }
  0x15   :  { %260 = vmatprep.subr.mxu0 %v314_v0  ;;  %295 = vmatprep.subr.mxu1 %v314_v0 }
  0x16   :  { %261 = vmatpush3.msra.mxu0 %v23_v11  ;;  %296 = vmatpush3.msra.mxu1 %v23_v11 }
  0x17   :  { %262 = vmatprep.subr.mxu0 %v314_v0  ;;  %297 = vmatprep.subr.mxu1 %v314_v0 }
  0x18   :  { %263 = vmatpush3.msra.mxu0 %v22_v12  ;;  %298 = vmatpush3.msra.mxu1 %v22_v12 }
  0x19   :  { %264 = vmatprep.subr.mxu0 %v314_v0  ;;  %299 = vmatprep.subr.mxu1 %v314_v0 }
  0x1a   :  { %265 = vmatpush3.msra.mxu0 %v21_v13  ;;  %300 = vmatpush3.msra.mxu1 %v21_v13 }
  0x1b   :  { %266 = vmatprep.subr.mxu0 %v314_v0  ;;  %301 = vmatprep.subr.mxu1 %v314_v0 }
  0x1c   :  { %267 = vmatpush3.msra.mxu0 %v20_v14  ;;  %302 = vmatpush3.msra.mxu1 %v20_v14 }
  0x1d   :  { %268 = vmatprep.subr.mxu0 %v314_v0  ;;  %303 = vmatprep.subr.mxu1 %v314_v0 }
  0x1e   :  { %269 = vmatpush3.msra.mxu0 %v19_v15  ;;  %304 = vmatpush3.msra.mxu1 %v19_v15 }
  0x1f   :  { %270 = vmatprep.subr.mxu0 %v314_v0  ;;  %305 = vmatprep.subr.mxu1 %v314_v0 }
  0x20   :  { %271 = vmatpush3.msra.mxu0 %v18_v17  ;;  %272 = vmatprep.mubr.msk.f32.mxu0 %vm315_vm0, %v314_v0 }
  0x21   :  { %306 = vmatpush3.msra.mxu1 %v18_v17  ;;  %307 = vmatprep.mubr.msk.f32.mxu1 %vm315_vm0, %v314_v0 }
  0x22   :  { %273 = vmatmul.mubr.f32.vlgmr.msra.gmra.mxu0 %v17_v16  ;;  %308 = vmatmul.mubr.f32.vlgmr.msra.gmra.mxu1 %v104_v18 }
  0xe2   :  { %v100_v19 = vpop.f32.mrf.mxu0  ;;  %v171_v20 = vpop.f32.mrf.mxu1 }
  0xe3   :  { %v175_v21 = vmul.f32 0.03125, %v100_v19  ;;  %v176_v22 = vmul.f32 0.03125, %v171_v20 }
  0xe4   :  { %v274_v23 = vpop.f32.mrf.mxu0  ;;  %v309_v24 = vpop.f32.mrf.mxu1 }
  0xe5   :  { %v177_v25 = vmul.f32 %v175_v21, %v175_v21  ;;  %v181_v28 = vsub.f32 %v17_v16, %v175_v21 }
  0xe7   :  { %v178_v26 = vsub.f32 %v176_v22, %v177_v25 }
  0xe9   :  { %v179_v27 = vadd.f32 1e-05, %v178_v26 }
  0xeb   :  { %312 = vrsqrt.f32 %v179_v27 }
  0xf8   :  { %v313_v29 = vpop.eup %312 }
  0xf9   :  { %v182_v31 = vmul.f32 %v313_v29, %v181_v28 }
  0xfb   :  { %v190_v33 = vmul.f32 %v204_v30, %v182_v31 }
  0xfd   :  { %v198_v34 = vadd.f32 %v205_v32, %v190_v33 }
  0xff   :  { %199 = vst [vmem:[%s439_s4] sm:$0xf] %v198_v34 }

</bundles_post_ra>
